<compile_context>
chip_gen: v7x
topology: tpu7x:2x2x1
jax: 0.10.0
libtpu: 0.0.40
codegen_flags: <defaults>
</compile_context>

<pallas_src>
import functools

import jax
import jax.numpy as jnp
from jax.experimental import pallas as pl
from jax.experimental.pallas import tpu as pltpu


# ---------------------------------------------------------------------------
# Helpers
# ---------------------------------------------------------------------------

def _receptive_field(layers, kernel_size):
    rf = 1
    additional = kernel_size - 1
    for _ in range(layers):
        rf += additional
        additional *= 2
    return rf


def _choose_n_tile(N, T, Cin, budget_bytes=4 << 20):
    """Largest N-tile (multiple of 8, dividing N) whose x slab fits the budget."""
    if N % 8 != 0:
        return N                      # full-dim block is always layout-legal
    cands = [c for c in range(8, N + 1, 8)
             if N % c == 0 and T * c * Cin * 4 <= budget_bytes]
    return max(cands) if cands else N


# ---------------------------------------------------------------------------
# Fused dilated-conv kernel body
# ---------------------------------------------------------------------------

def _make_conv_kernel(T_out, dilation, K, Cin):
    """out = concat_k(x[t + k*dilation, :, :]) @ w_cat + b  (one MXU contraction)."""

    def kernel(x_ref, w_ref, b_ref, o_ref):
        # x_ref: (T, n_tile, Cin)  f32 slab, read from HBM once per step.
        # w_ref: (K*Cin, Cout)     bf16, resident across the whole grid.
        # b_ref: (1, Cout)         f32, resident.
        # o_ref: (T_out, n_tile, Cout) f32, lane-dense store.
        n_tile = x_ref.shape[1]
        x = x_ref[...]
        taps = [
            x[k * dilation: k * dilation + T_out]          # static time slice
            .reshape(T_out * n_tile, Cin)
            for k in range(K)
        ]
        # Single lane-dense (K*Cin)-deep contraction; bf16 operands, f32 acc.
        x_cat = jnp.concatenate(taps, axis=-1).astype(jnp.bfloat16)
        acc = jnp.dot(x_cat, w_ref[...], preferred_element_type=jnp.float32)
        acc = acc + b_ref[...]
        o_ref[...] = acc.reshape(o_ref.shape).astype(o_ref.dtype)

    return kernel


# ---------------------------------------------------------------------------
# Forward pass
# ---------------------------------------------------------------------------

def d_cn_forward(x, conv_params, kernel_size=2):
    """D_CN.forward.  x: (B, T, N, Cin) f32 -> (B, T_out, N, Cout) f32.

    conv_params: list of (weight (Cout, Cin, 1, K), bias (Cout,)) in PyTorch
    Conv2d layout, one per layer.  Only the last layer contributes to the
    output (the PyTorch loop overwrites `left` every iteration — if the
    upstream module ever adds a residual/sum this shortcut must be revisited).
    """
    B, T, N, Cin = x.shape
    layers = len(conv_params)
    assert layers >= 1
    rf = _receptive_field(layers, kernel_size)

    # Left-pad the time axis (matches F.pad(x, (rf - in_len, 0, 0, 0))).
    if T < rf:
        x = jnp.pad(x, ((0, 0), (rf - T, 0), (0, 0), (0, 0)))
        T = rf

    w, b = conv_params[-1]                      # only the last layer is live
    Cout = w.shape[0]
    K = w.shape[3]
    dilation = 2 ** (layers - 1)
    T_out = T - dilation * (K - 1)

    # Fold the K taps into one (K*Cin, Cout) weight so the kernel does a single
    # lane-dense contraction.  Weights/bias are tiny; casting them here is free.
    w_cat = jnp.concatenate(
        [jnp.transpose(w[:, :, 0, k]) for k in range(K)], axis=0
    ).astype(jnp.bfloat16)                      # (K*Cin, Cout)
    b2 = b.reshape(1, Cout).astype(jnp.float32)

    # Grid over (batch, N-tiles); time stays whole so the dilated taps can be
    # sliced in-kernel from one slab (x read once, no halo duplication).
    n_tile = _choose_n_tile(N, T, Cin)
    n_blocks = N // n_tile
    # v7x: keep >= 2 grid steps so both TensorCores get work.
    if B * n_blocks < 2 and N >= 16 and (N // 2) % 8 == 0:
        n_tile = N // 2
        n_blocks = 2
    grid = (B, n_blocks)

    x_spec = pl.BlockSpec((None, T, n_tile, Cin), lambda bi, ni: (bi, 0, ni, 0))
    w_spec = pl.BlockSpec((K * Cin, Cout), lambda bi, ni: (0, 0))
    b_spec = pl.BlockSpec((1, Cout), lambda bi, ni: (0, 0))
    out_spec = pl.BlockSpec((None, T_out, n_tile, Cout),
                            lambda bi, ni: (bi, 0, ni, 0))

    # VMEM budget: double-buffered x slab + output tile, resident weights/bias,
    # plus headroom for the in-kernel concat/cast temporaries.  Cap below the
    # per-core capacity (v7x only has 64 MiB per TensorCore).
    step_bytes = (2 * T * n_tile * Cin * 4            # x slab, 2 buffers
                  + 2 * T_out * n_tile * Cout * 4     # f32 out tile, 2 buffers
                  + K * Cin * Cout * 2 + Cout * 4     # resident weights + bias
                  + 2 * T_out * n_tile * K * Cin * 4) # concat/cast temporaries
    try:
        vmem_cap = int(pltpu.get_tpu_info().vmem_capacity_bytes * 3 // 4)
    except Exception:  # pragma: no cover - conservative fallback
        vmem_cap = 48 << 20
    vmem_limit = int(min(max(2 * step_bytes, 8 << 20), vmem_cap))

    cost = pl.CostEstimate(
        flops=2 * B * T_out * N * K * Cin * Cout,
        transcendentals=0,
        bytes_accessed=(B * T * N * Cin * 4           # x read once
                        + K * Cin * Cout * 2 + Cout * 4
                        + B * T_out * N * Cout * 4),
    )

    return pl.pallas_call(
        _make_conv_kernel(T_out, dilation, K, Cin),
        out_shape=jax.ShapeDtypeStruct((B, T_out, N, Cout), jnp.float32),
        grid=grid,
        in_specs=[x_spec, w_spec, b_spec],
        out_specs=out_spec,
        compiler_params=pltpu.CompilerParams(
            dimension_semantics=("parallel", "parallel"),
            vmem_limit_bytes=vmem_limit),
        cost_estimate=cost,
    )(x, w_cat, b2)


# ---------------------------------------------------------------------------
# Pure-JAX f32 reference (mirrors the PyTorch forward) + parameter init
# ---------------------------------------------------------------------------

def d_cn_reference(x, conv_params, kernel_size=2):
    B, T, N, Cin = x.shape
    layers = len(conv_params)
    rf = _receptive_field(layers, kernel_size)
    if T < rf:
        x = jnp.pad(x, ((0, 0), (rf - T, 0), (0, 0), (0, 0)))
        T = rf
    w, b = conv_params[-1]
    Cout, _, _, K = w.shape
    dilation = 2 ** (layers - 1)
    T_out = T - dilation * (K - 1)
    out = jnp.broadcast_to(b.reshape(1, 1, 1, Cout),
                           (B, T_out, N, Cout)).astype(jnp.float32)
    for k in range(K):
        xk = x[:, k * dilation: k * dilation + T_out]       # (B, T_out, N, Cin)
        out = out + jnp.einsum('btnc,oc->btno', xk, w[:, :, 0, k],
                               precision=jax.lax.Precision.HIGHEST)
    return out


def init_params(key, in_dim, out_dim, layers, kernel_size):
    """Conv2d(in_dim, out_dim, kernel_size=(1, K), dilation=2^i) params."""
    params = []
    for _ in range(layers):
        key, kw, kb = jax.random.split(key, 3)
        w = 0.1 * jax.random.normal(kw, (out_dim, in_dim, 1, kernel_size),
                                    jnp.float32)
        b = 0.1 * jax.random.normal(kb, (out_dim,), jnp.float32)
        params.append((w, b))
    return params


if __name__ == "__main__":
    key = jax.random.PRNGKey(0)

    B, T, N = 2, 8, 16           # batch, seq, spatial (nodes)
    in_dim, out_dim = 64, 128    # K*Cin = 128 contraction depth, Cout = 128 lanes
    layers, kernel_size = 2, 2   # receptive_field = 4, last-layer dilation = 2

    k_x, k_p = jax.random.split(key)
    x = jax.random.normal(k_x, (B, T, N, in_dim), jnp.float32)
    params = init_params(k_p, in_dim, out_dim, layers, kernel_size)

    fwd = jax.jit(functools.partial(d_cn_forward, kernel_size=kernel_size))
    out = jax.block_until_ready(fwd(x, params))

    T_out = T - (2 ** (layers - 1)) * (kernel_size - 1)
    assert out.shape == (B, T_out, N, out_dim), out.shape

    ref = d_cn_reference(x, params, kernel_size=kernel_size)
    err = float(jnp.max(jnp.abs(out - ref)))
    assert jnp.allclose(out, ref, rtol=5e-2, atol=5e-2), err

    print("KERNEL_OK")
</pallas_src>

<mosaic_0001>
module attributes {stable_mosaic.version = 11 : i64} {
  func.func @kernel(%arg0: i32, %arg1: i32, %arg2: memref<1x8x16x64xf32, #tpu.memory_space<vmem>>, %arg3: memref<128x128xbf16, #tpu.memory_space<vmem>>, %arg4: memref<1x128xf32, #tpu.memory_space<vmem>>, %arg5: memref<1x6x16x128xf32, #tpu.memory_space<vmem>>) attributes {dimension_semantics = [#tpu.dimension_semantics<parallel>, #tpu.dimension_semantics<parallel>], iteration_bounds = array<i64: 2, 1>, scalar_prefetch = 0 : i64, scratch_operands = 0 : i64, tpu.core_type = #tpu.core_type<tc>, window_params = [{transform_indices = @transform_0, window_bounds = array<i64: 1, 8, 16, 64>}, {pipeline_mode = #tpu.pipeline_mode<synchronous>, transform_indices = @transform_1, window_bounds = array<i64: 128, 128>}, {pipeline_mode = #tpu.pipeline_mode<synchronous>, transform_indices = @transform_2, window_bounds = array<i64: 1, 128>}, {transform_indices = @transform_3, window_bounds = array<i64: 1, 6, 16, 128>}]} {
    %c0 = arith.constant 0 : index
    %c0_0 = arith.constant 0 : index
    %c0_1 = arith.constant 0 : index
    %c0_2 = arith.constant 0 : index
    %0 = vector.load %arg2[%c0, %c0_0, %c0_1, %c0_2] : memref<1x8x16x64xf32, #tpu.memory_space<vmem>>, vector<1x8x16x64xf32>
    %1 = vector.shape_cast %0 : vector<1x8x16x64xf32> to vector<8x16x64xf32>
    %2 = vector.extract_strided_slice %1 {offsets = [0, 0, 0], sizes = [6, 16, 64], strides = [1, 1, 1]} : vector<8x16x64xf32> to vector<6x16x64xf32>
    %3 = vector.shape_cast %2 : vector<6x16x64xf32> to vector<96x64xf32>
    %4 = vector.extract_strided_slice %1 {offsets = [2, 0, 0], sizes = [6, 16, 64], strides = [1, 1, 1]} : vector<8x16x64xf32> to vector<6x16x64xf32>
    %5 = vector.shape_cast %4 : vector<6x16x64xf32> to vector<96x64xf32>
    %6 = tpu.concatenate %3, %5 in 1 : vector<96x64xf32>, vector<96x64xf32> -> vector<96x128xf32>
    %7 = arith.truncf %6 : vector<96x128xf32> to vector<96x128xbf16>
    %c0_3 = arith.constant 0 : index
    %c0_4 = arith.constant 0 : index
    %8 = vector.load %arg3[%c0_3, %c0_4] : memref<128x128xbf16, #tpu.memory_space<vmem>>, vector<128x128xbf16>
    %cst = arith.constant dense<0.000000e+00> : vector<96x128xf32>
    %9 = tpu.matmul %7, %8, %cst {dimension_numbers = #tpu.dot_dimension_numbers<[1], [0], [0], [1], [0, 0, 1, 1], [], []>} : vector<96x128xbf16>, vector<128x128xbf16>, vector<96x128xf32> -> vector<96x128xf32>
    %c0_5 = arith.constant 0 : index
    %c0_6 = arith.constant 0 : index
    %10 = vector.load %arg4[%c0_5, %c0_6] : memref<1x128xf32, #tpu.memory_space<vmem>>, vector<1x128xf32>
    %11 = vector.broadcast %10 : vector<1x128xf32> to vector<96x128xf32>
    %12 = arith.addf %9, %11 : vector<96x128xf32>
    %13 = vector.shape_cast %12 : vector<96x128xf32> to vector<6x16x128xf32>
    %c0_7 = arith.constant 0 : index
    %c0_8 = arith.constant 0 : index
    %c0_9 = arith.constant 0 : index
    %c0_10 = arith.constant 0 : index
    %14 = vector.load %arg5[%c0_7, %c0_8, %c0_9, %c0_10] : memref<1x6x16x128xf32, #tpu.memory_space<vmem>>, vector<1x6x16x128xf32>
    %15 = vector.shape_cast %14 : vector<1x6x16x128xf32> to vector<6x16x128xf32>
    %16 = vector.shape_cast %13 : vector<6x16x128xf32> to vector<1x6x16x128xf32>
    tpu.vector_store %arg5[%c0_7, %c0_8, %c0_9, %c0_10], %16 {strides = array<i32>} : memref<1x6x16x128xf32, #tpu.memory_space<vmem>>, vector<1x6x16x128xf32>,
    return
  }
  func.func @transform_0(%arg0: i32, %arg1: i32) -> (i32, i32, i32, i32) {
    %c0_i32 = arith.constant 0 : i32
    %c0_i32_0 = arith.constant 0 : i32
    %c0_i32_1 = arith.constant 0 : i32
    return %arg0, %c0_i32, %arg1, %c0_i32_0 : i32, i32, i32, i32
  }
  func.func @transform_1(%arg0: i32, %arg1: i32) -> (i32, i32) {
    %c0_i32 = arith.constant 0 : i32
    %c0_i32_0 = arith.constant 0 : i32
    %c0_i32_1 = arith.constant 0 : i32
    return %c0_i32, %c0_i32_0 : i32, i32
  }
  func.func @transform_2(%arg0: i32, %arg1: i32) -> (i32, i32) {
    %c0_i32 = arith.constant 0 : i32
    %c0_i32_0 = arith.constant 0 : i32
    %c0_i32_1 = arith.constant 0 : i32
    return %c0_i32, %c0_i32_0 : i32, i32
  }
  func.func @transform_3(%arg0: i32, %arg1: i32) -> (i32, i32, i32, i32) {
    %c0_i32 = arith.constant 0 : i32
    %c0_i32_0 = arith.constant 0 : i32
    %c0_i32_1 = arith.constant 0 : i32
    return %arg0, %c0_i32, %arg1, %c0_i32_0 : i32, i32, i32, i32
  }
}

</mosaic_0001>

<bundles_post_ra>
// kernel: d_cn_forward.1
= control target key start
LH: loop header
LB: loop body
LE: loop exit
PB: predicated region body
PF: predicated region fallthrough
CT: control target
= control target key end

     0   :  { %8 = vsyncpa [#allocation3], 0  ;;  %s1038_s0 = inlined_call_operand.vmem [shape: f32[2,8,16,64], index: 0, kind: input, shape index: {}]   ;;  %s1039_s1 = inlined_call_operand.vmem [shape: bf16[128,128], index: 1, kind: input, shape index: {}]   ;;  %s1040_s2 = inlined_call_operand.vmem [shape: f32[1,128], index: 2, kind: input, shape index: {}]   ;;  %s1041_s3 = inlined_call_operand.hbm [shape: f32[2,6,16,128], index: 3, kind: output, shape index: {}]  }
   0x1   :  { %10 = vsyncpa [#allocation3 + $0x1], 0  ;;  %s823_s12 = smov 0   ;;  %s825_s13 = smov 0  }
   0x2   :  { %s827_s14 = smov 0   ;;  %s829_s15 = smov 0  }
   0x3   :  { %s831_s16 = smov 0   ;;  %s833_s17 = smov 0  }
   0x4 LB: > { %s543_s18 = sadd.s32 4294967295, %s797_s17   ;;  %s544_s19 = sadd.s32 4294967294, %s797_s17   ;;  %s797_s17 = sphi %s833_s17, %s16_s17   ;;  %s793_s16 = sphi %s831_s16, %s1048_s16   ;;  %s789_s15 = sphi %s829_s15, %s1047_s15   ;;  %s785_s14 = sphi %s827_s14, %s1046_s14   ;;  %s781_s13 = sphi %s825_s13, %s1045_s13   ;;  %s777_s12 = sphi %s823_s12, %s1044_s12  }
   0x5   : > { %s28_s20 = sadd.s32 1, %s793_s16  ;;  %s107_s21 = sadd.s32 1, %s785_s14 }
   0x6   : > { %p30_p0 = scmp.ge.s32.totalorder %s28_s20, 2  ;;  %p117_p1 = scmp.ne.s32.totalorder %s785_s14, %s781_s13 }
   0x7   : > { %p118_p2 = scmp.eq.s32.totalorder %s543_s18, 1  ;;  %p123_p3 = scmp.ne.s32.totalorder %s781_s13, %s777_s12 }
   0x8   : > { %s1050_s20 = smov (%p30_p0, %s28_s20), 0  ;;  %p124_p5 = scmp.eq.s32.totalorder %s544_s19, 1 }
   0x9   : > { %p863_p4 = por %p118_p2, %p117_p1  ;;  %s102_s23 = ssub.s32 %s793_s16, %s1050_s20 }
   0xa   : > { %p547_p6 = scmp.ge.s32.totalorder %s797_s17, 1  ;;  %p105_p7 = scmp.eq.s32.totalorder %s102_s23, 0 }
   0xb   : > { %p870_p8 = por %p124_p5, %p123_p3  ;;  %p161_p9 = scmp.lt.s32.totalorder %s797_s17, 3 }
   0xc   : > { %s876_s25 = scalar_select %p105_p7, %s785_s14, %s107_s21  }
   0xd   : > { %p162_p10 = pnand %p547_p6, %p161_p9 }
   0xe   : > { %p190_p11 = scmp.lt.s32.totalorder (!%p162_p10), %s789_s15, 1  ;;  %v711_v0 = vld [vmem:[%s1039_s1] sm:$0xff] (!%p162_p10)   ;;  %v712_v1 = vld [vmem:[%s1039_s1 + $0x8] sm:$0xff] (!%p162_p10)   ;;  %v713_v2 = vld [vmem:[%s1039_s1 + $0x10] sm:$0xff] (!%p162_p10)   ;;  %s799_s10 = smov (!%p162_p10), 64   ;;  %vm265_vm0 = vcmask (!%p162_p10), 523264  }
   0xf   : > { %165 = sbr.rel (%p162_p10) target bundleno = 393 (0x189), region = 32  ;;  %605 = vmatprep.subr.bf16.mxu1 (!%p162_p10), %v711_v0  ;;  %577 = vmatprep.subr.bf16.mxu0 (!%p162_p10), %v711_v0  ;;  %v714_v16 = vld [vmem:[%s1039_s1 + $0x18] sm:$0xff] (!%p162_p10)   ;;  %v715_v21 = vld [vmem:[%s1039_s1 + $0x20] sm:$0xff] (!%p162_p10)   ;;  %v716_v23 = vld [vmem:[%s1039_s1 + $0x28] sm:$0xff] (!%p162_p10)   ;;  %s800_s23 = smov (!%p162_p10), [#allocation2]  }
  0x10   : > { %613 = vmatpush3.bf16.msra.mxu1 (!%p162_p10), %v711_v0  ;;  %578 = vmatpush3.bf16.msra.mxu0 (!%p162_p10), %v711_v0  ;;  %v717_v24 = vld [vmem:[%s1039_s1 + $0x30] sm:$0xff] (!%p162_p10)   ;;  %v718_v25 = vld [vmem:[%s1039_s1 + $0x38] sm:$0xff] (!%p162_p10)   ;;  %s622_s9 = smul.u32 (!%p162_p10), 1536, %s789_s15  ;;  %s723_s26 = sshll.u32 (!%p162_p10), %s800_s23, 4  ;;  %s724_s26 = int_to_ptr.vmem [resolvable:$false] %s723_s26 }
  0x11   : > { %606 = vmatprep.subr.bf16.mxu1 (!%p162_p10), %v712_v1  ;;  %579 = vmatprep.subr.bf16.mxu0 (!%p162_p10), %v712_v1  ;;  %s725_s27 = scalar_lea.vmem (!%p162_p10), %s724_s26, 3072 }
  0x12   : > { %s983_s18 = scalar_lea.hbm (!%p162_p10), %s1041_s3, %s622_s9 }
  0x14   : > { %614 = vmatpush3.bf16.msra.mxu1 (!%p162_p10), %v712_v1  ;;  %580 = vmatpush3.bf16.msra.mxu0 (!%p162_p10), %v712_v1 }
  0x15   : > { %607 = vmatprep.subr.bf16.mxu1 (!%p162_p10), %v713_v2  ;;  %581 = vmatprep.subr.bf16.mxu0 (!%p162_p10), %v713_v2 }
  0x16   : > { %s191_s28 = scalar_select %p190_p11, %s789_s15, 1 }
  0x18   : > { %s562_s4 = sshll.u32 %s191_s28, 7  ;;  %615 = vmatpush3.bf16.msra.mxu1 %v713_v2  ;;  %582 = vmatpush3.bf16.msra.mxu0 %v713_v2  ;;  %v550_v2 = vld [vmem:[%s1040_s2] ss:$0 sm:$0xff] }
  0x19   : > { %s889_s7 = scalar_lea.vmem %s1038_s0, %s562_s4  ;;  %608 = vmatprep.subr.bf16.mxu1 %v714_v16  ;;  %583 = vmatprep.subr.bf16.mxu0 %v714_v16  ;;  %s186_s4 = sand.u32 1, %s781_s13  }
  0x1a   : > { %v895_v3 = vld [vmem:[%s889_s7 + $0x40] sm:$0xff]  ;;  %v898_v4 = vld [vmem:[%s889_s7 + $0x48] sm:$0xff]  ;;  %v901_v5 = vld [vmem:[%s889_s7 + $0x50] sm:$0xff]  ;;  %s621_s5 = smul.u32 96, %s186_s4  ;;  %s992_s19 = scalar_lea.sflag [#allocation3], %s186_s4 }
  0x1b   : > { %v681_v6 = vpack.i.bf16 %v898_v4, %v895_v3  ;;  %v906_v7 = vld [vmem:[%s889_s7 + $0x58] sm:$0xff]  ;;  %v205_v8 = vld [vmem:[%s889_s7 + $0x20] sm:$0xff]  ;;  %v206_v9 = vld [vmem:[%s889_s7 + $0x28] sm:$0xff] }
  0x1c   : > { %v691_v10 = vpack.i.bf16 %v206_v9, %v205_v8  ;;  %v213_v11 = vld [vmem:[%s889_s7 + $0x60] sm:$0xff]  ;;  %v214_v12 = vld [vmem:[%s889_s7 + $0x68] sm:$0xff]  ;;  %v686_v13 = vpack.i.bf16 %v906_v7, %v901_v5  ;;  %v915_v14 = vld [vmem:[%s889_s7 + $0x30] sm:$0xff]  ;;  %616 = vmatpush3.bf16.msra.mxu1 %v714_v16  ;;  %584 = vmatpush3.bf16.msra.mxu0 %v714_v16  ;;  %s967_s8 = scalar_lea.vmem [#allocation2], %s621_s5 }
  0x1d   : > { %682 = vrot.lane.b32.xlu0 %v681_v6, %s799_s10  ;;  %v918_v15 = vld [vmem:[%s889_s7 + $0x38] sm:$0xff]  ;;  %v696_v17 = vpack.i.bf16 %v214_v12, %v213_v11  ;;  %v215_v18 = vld [vmem:[%s889_s7 + $0x70] sm:$0xff]  ;;  %609 = vmatprep.subr.bf16.mxu1 %v715_v21  ;;  %v201_v30 = vld [vmem:[%s889_s7] sm:$0xff] }
  0x1e   : > { %692 = vrot.lane.b32.xlu1 %v691_v10, %s799_s10  ;;  %v216_v19 = vld [vmem:[%s889_s7 + $0x78] sm:$0xff]  ;;  %v701_v20 = vpack.i.bf16 %v918_v15, %v915_v14  ;;  %585 = vmatprep.subr.bf16.mxu0 %v715_v21  ;;  %v202_v31 = vld [vmem:[%s889_s7 + $0x8] sm:$0xff]  ;;  %v203_v52 = vld [vmem:[%s889_s7 + $0x10] sm:$0xff] }
  0x1f   : > { %v706_v22 = vpack.i.bf16 %v216_v19, %v215_v18  ;;  %v204_v53 = vld [vmem:[%s889_s7 + $0x18] sm:$0xff] }
  0x20   : > { %617 = vmatpush3.bf16.msra.mxu1 %v715_v21  ;;  %586 = vmatpush3.bf16.msra.mxu0 %v715_v21 }
  0x21   : > { %687 = vrot.lane.b32.xlu0 %v686_v13, %s799_s10  ;;  %610 = vmatprep.subr.bf16.mxu1 %v716_v23 }
  0x22   : > { %697 = vrot.lane.b32.xlu1 %v696_v17, %s799_s10  ;;  %587 = vmatprep.subr.bf16.mxu0 %v716_v23 }
  0x24   : > { %618 = vmatpush3.bf16.msra.mxu1 %v716_v23  ;;  %588 = vmatpush3.bf16.msra.mxu0 %v716_v23 }
  0x25   : > { %702 = vrot.lane.b32.xlu0 %v701_v20, %s799_s10  ;;  %611 = vmatprep.subr.bf16.mxu1 %v717_v24 }
  0x26   : > { %707 = vrot.lane.b32.xlu1 %v706_v22, %s799_s10  ;;  %589 = vmatprep.subr.bf16.mxu0 %v717_v24  ;;  %s464_s10 = sshll.u32 %s967_s8, 4  ;;  %s985_s10 = int_to_ptr.vmem [resolvable:$true] %s464_s10 }
  0x27   : > { %s719_s21 = scalar_lea.vmem %s985_s10, 1536  ;;  %p726_p1 = scmp.lt.s32.totalorder %s985_s10, %s724_s26 }
  0x28   : > { %619 = vmatpush3.bf16.msra.mxu1 %v717_v24  ;;  %590 = vmatpush3.bf16.msra.mxu0 %v717_v24  ;;  %p720_p12 = scmp.ne.s32.totalorder %s985_s10, %s719_s21  ;;  %p727_p2 = scmp.lt.s32.totalorder %s725_s27, %s719_s21 }
  0x29   : > { %612 = vmatprep.subr.bf16.mxu1 %v718_v25  ;;  %591 = vmatprep.subr.bf16.mxu0 %v718_v25 }
  0x2a   : > { %p721_p13 = pnand %p720_p12, %p863_p4  ;;  %p728_p3 = por %p727_p2, %p726_p1 }
  0x2c   : > { %620 = vmatpush3.bf16.msra.mxu1 %v718_v25  ;;  %592 = vmatpush3.bf16.msra.mxu0 %v718_v25  ;;  %p722_p0 = pneg %p721_p13 }
  0x2e   : > { %p729_p5 = pnand %p728_p3, %p722_p0 }
  0x8f   : > { %v683_v26 = vpop.permute.xlu0 %682 }
  0x90   : > { %v685_v27 = vunpack.i.h.bf16 %v683_v26  ;;  %v684_v28 = vunpack.i.l.bf16 %v683_v26  ;;  %v693_v29 = vpop.permute.xlu1 %692 }
  0x91   : > { %v695_v32 = vunpack.i.h.bf16 %v693_v29  ;;  %v694_v33 = vunpack.i.l.bf16 %v693_v29 }
  0x92   : > { %v270_v34 = vsel %vm265_vm0, %v205_v8, %v684_v28  ;;  %v271_v35 = vsel %vm265_vm0, %v206_v9, %v685_v27 }
  0x93   : > { %v688_v36 = vpop.permute.xlu0 %687  ;;  %v280_v37 = vpack.c.bf16 %v271_v35, %v270_v34  ;;  %v266_v38 = vsel %vm265_vm0, %v201_v30, %v694_v33  ;;  %v267_v39 = vsel %vm265_vm0, %v202_v31, %v695_v32 }
  0x94   : > { %v690_v40 = vunpack.i.h.bf16 %v688_v36  ;;  %v689_v41 = vunpack.i.l.bf16 %v688_v36  ;;  %v698_v42 = vpop.permute.xlu1 %697  ;;  %v278_v43 = vpack.c.bf16 %v267_v39, %v266_v38 }
  0x95   : > { %597 = vmatprep.mubr.bf16.mxu1 %v280_v37  ;;  %v700_v44 = vunpack.i.h.bf16 %v698_v42  ;;  %v699_v45 = vunpack.i.l.bf16 %v698_v42 }
  0x96   : > { %593 = vmatprep.mubr.bf16.mxu0 %v278_v43  ;;  %v272_v46 = vsel %vm265_vm0, %v915_v14, %v689_v41  ;;  %v273_v47 = vsel %vm265_vm0, %v918_v15, %v690_v40 }
  0x97   : > { %v703_v48 = vpop.permute.xlu0 %702  ;;  %v281_v49 = vpack.c.bf16 %v273_v47, %v272_v46  ;;  %v274_v50 = vsel %vm265_vm0, %v895_v3, %v699_v45  ;;  %v275_v51 = vsel %vm265_vm0, %v898_v4, %v700_v44 }
  0x98   : > { %v705_v54 = vunpack.i.h.bf16 %v703_v48  ;;  %v704_v55 = vunpack.i.l.bf16 %v703_v48  ;;  %v708_v56 = vpop.permute.xlu1 %707  ;;  %v282_v57 = vpack.c.bf16 %v275_v51, %v274_v50 }
  0x99   : > { %598 = vmatmul.mubr.bf16.vlgmr.msra.gmra.mrb[0].mxu1 %v281_v49  ;;  %v710_v58 = vunpack.i.h.bf16 %v708_v56  ;;  %v709_v59 = vunpack.i.l.bf16 %v708_v56 }
  0x9a   : > { %601 = vmatprep.mubr.bf16.mxu1 %v282_v57  ;;  %v268_v60 = vsel %vm265_vm0, %v203_v52, %v704_v55  ;;  %v269_v61 = vsel %vm265_vm0, %v204_v53, %v705_v54 }
  0x9b   : > { %v279_v62 = vpack.c.bf16 %v269_v61, %v268_v60  ;;  %v276_v63 = vsel %vm265_vm0, %v901_v5, %v709_v59  ;;  %v277_v0 = vsel %vm265_vm0, %v906_v7, %v710_v58 }
  0x9c   : > { %v283_v1 = vpack.c.bf16 %v277_v0, %v276_v63 }
  0x9d   : > { %594 = vmatmul.mubr.bf16.vlgmr.msra.gmra.mrb[0].mxu0 %v279_v62 }
  0xa1   : > { %602 = vmatmul.mubr.bf16.gmra.mrb[4].mxu1 %v283_v1 }
 0x16c   : > { %v599_v3 = vpop.f32.mrb[0].mxu1 }
 0x16d   : > { %v414_v4 = vadd.f32 %v599_v3, %v550_v2  ;;  %v405_v6 = vpop.f32.mrb[1].mxu1 }
 0x16e   : > { %v406_v8 = vadd.f32 %v550_v2, %v405_v6  ;;  %v600_v9 = vpop.f32.mrb[2].mxu1 }
 0x16f   : > { %442 = vst [vmem:[%s967_s8 + $0x30] sm:$0xff] %v414_v4  ;;  %v417_v5 = vadd.f32 %v600_v9, %v550_v2  ;;  %v408_v7 = vpop.f32.mrb[3].mxu1 }
 0x170   : > { %440 = vst [vmem:[%s967_s8 + $0x20] sm:$0xff] %v406_v8  ;;  %v409_v10 = vadd.f32 %v550_v2, %v408_v7  ;;  %v595_v11 = vpop.f32.mrb[0].mxu0 }
 0x171   : > { %443 = vst [vmem:[%s967_s8 + $0x38] sm:$0xff] %v417_v5  ;;  %v398_v12 = vadd.f32 %v595_v11, %v550_v2  ;;  %v389_v13 = vpop.f32.mrb[1].mxu0 }
 0x172   : > { %441 = vst [vmem:[%s967_s8 + $0x28] sm:$0xff] %v409_v10  ;;  %v390_v14 = vadd.f32 %v550_v2, %v389_v13  ;;  %v596_v15 = vpop.f32.mrb[2].mxu0 }
 0x173   : > { %438 = vst [vmem:[%s967_s8 + $0x10] sm:$0xff] %v398_v12  ;;  %v401_v16 = vadd.f32 %v596_v15, %v550_v2  ;;  %v392_v17 = vpop.f32.mrb[3].mxu0 }
 0x174   : > { %436 = vst [vmem:[%s967_s8] sm:$0xff] %v390_v14  ;;  %v393_v18 = vadd.f32 %v550_v2, %v392_v17  ;;  %v603_v19 = vpop.f32.mrb[4].mxu1 }
 0x175   : > { %439 = vst [vmem:[%s967_s8 + $0x18] sm:$0xff] %v401_v16  ;;  %v430_v20 = vadd.f32 %v603_v19, %v550_v2  ;;  %v421_v21 = vpop.f32.mrb[5].mxu1 }
 0x176   : > { %437 = vst [vmem:[%s967_s8 + $0x8] sm:$0xff] %v393_v18  ;;  %v422_v22 = vadd.f32 %v550_v2, %v421_v21  ;;  %v604_v23 = vpop.f32.mrb[6].mxu1 }
 0x177   : > { %446 = vst [vmem:[%s967_s8 + $0x50] sm:$0xff] %v430_v20  ;;  %v433_v24 = vadd.f32 %v604_v23, %v550_v2  ;;  %v424_v25 = vpop.f32.mrb[7].mxu1 }
 0x178   : > { %444 = vst [vmem:[%s967_s8 + $0x40] sm:$0xff] %v422_v22  ;;  %v425_v26 = vadd.f32 %v550_v2, %v424_v25 }
 0x179   : > { %447 = vst [vmem:[%s967_s8 + $0x58] sm:$0xff] %v433_v24 }
 0x17a   : > { %445 = vst [vmem:[%s967_s8 + $0x48] sm:$0xff] %v425_v26 }
 0x17b   : > { %732 = shalt.err (!%p729_p5)
}
 0x17c   : > { %s733_s28 = scalar_lea.hbm %s983_s18, 1536  ;;  %s737_s4 = scalar_lea.hbm %s1041_s3, 3072 }
 0x17d   : > { %p734_p6 = scmp.ne.s32.totalorder %s983_s18, %s733_s28  ;;  %p738_p10 = scmp.lt.u32.totalorder %s983_s18, %s1041_s3 }
 0x17e   : > { %p739_p11 = scmp.lt.u32.totalorder %s737_s4, %s733_s28  ;;  %p741_p13 = scmp.lt.u32.totalorder %s733_s28, %s983_s18 }
 0x17f   : > { %p735_p7 = pnand %p734_p6, %p863_p4 }
 0x180   : > { %p740_p12 = por %p739_p11, %p738_p10 }
 0x181   : > { %p736_p9 = pneg %p735_p7 }
 0x182   : > { %p742_p0 = por %p741_p13, %p740_p12 }
 0x184   : > { %p743_p1 = pnand %p742_p0, %p736_p9 }
 0x186   : > { %746 = shalt.err (!%p743_p1)
}
 0x187   : > { %s801_s7 = smov 128   ;;  %s802_s8 = smov 8  }
 0x188   : > { %623 = dma.vmem_to_hbm [thread:$0]  (%p863_p4), %s985_s10, 1536, %s983_s18, %s992_s19, %s801_s7, %s801_s7, %s802_s8  }
 0x189 PF: > { %p629_p2 = scmp.ge.s32.totalorder %s797_s17, 2  ;;  %s479_s9 = sand.u32 1, %s777_s12  }
 0x18a   : > { %s480_s11 = scalar_lea.sflag [#allocation3], %s479_s9 }
 0x18b   : > { %p626_p3 = pnand %p629_p2, %p870_p8 }
 0x18d   : > { %772 = dma.done.wait (!%p626_p3), %s480_s11, 1536  }
 0x18e   : > { %774 = vsyncadd (!%p626_p3), %s480_s11, 4294965760  ;;  %s16_s17 = sadd.s32 1, %s797_s17   ;;  %s1044_s12 = smov %s781_s13 }
 0x18f   : > { %p13_p5 = scmp.ge.s32.totalorder %s16_s17, 4   ;;  %s1045_s13 = smov %s785_s14 }
 0x190   : > { %s1046_s14 = smov %s876_s25  ;;  %s1047_s15 = smov %s793_s16 }
 0x191   : > { %s1048_s16 = smov %s1050_s20  ;;  %15 = sbr.rel (!%p13_p5) target bundleno = 4 (0x4), region = 67 }
 0x198   :  { %485 = vsyncpa [#allocation3], 1 }
 0x199   :  { %487 = vsyncpa [#allocation3 + $0x1], 1 }

</bundles_post_ra>
